<compile_context>
chip_gen: v7x
topology: tpu7x:2x2x1
jax: 0.10.0
libtpu: 0.0.40
codegen_flags: <defaults>
</compile_context>

<pallas_src>
import math

import jax
import jax.numpy as jnp
from jax.experimental import pallas as pl
from jax.experimental.pallas import tpu as pltpu


def _drop_path_kernel(s_ref, x_ref, o_ref):
    # s_ref : (TB, 1)  per-sample scale = floor(keep_prob + u) / keep_prob, f32
    # x_ref : (TB, TN) tile of the flattened input
    # o_ref : (TB, TN) tile of the output
    o_ref[...] = (x_ref[...] * s_ref[...]).astype(o_ref.dtype)


def _per_buffer_target_bytes() -> int:
    """Generation-aware tile-size target (bytes per in/out VMEM buffer)."""
    try:
        kind = jax.devices()[0].device_kind.lower()
    except Exception:  # pragma: no cover - defensive
        kind = ""
    if "v7" in kind:
        return 8 << 20   # v7x: 3.2 TB/s HBM; amortize the ~0.35us/step overhead
    if "v6" in kind:
        return 4 << 20   # v6e: fits the 32 MiB scoped-VMEM default comfortably
    return 2 << 20       # v5e / unknown: conservative (16 MiB scoped default)


def drop_path_pallas(x, drop_prob=0.0, training=False, *, key=None,
                     min_pallas_bytes=1 << 20):
    """Exact semantics of basicsr DropPath.forward / drop_path().

    `key` must be a fresh jax.random key each training step.  Inputs smaller
    than `min_pallas_bytes` are handled by a fused pure-JAX expression (for a
    streaming multiply, XLA fusion into neighbors always beats a standalone
    kernel); pass min_pallas_bytes=0 to force the Pallas path.
    """
    if drop_prob == 0.0 or not training:
        return x
    if key is None:
        raise ValueError(
            "drop_path_pallas requires an explicit PRNG key when training "
            "with drop_prob > 0 (pass a fresh key every step).")

    keep_prob = 1.0 - float(drop_prob)
    B = int(x.shape[0])
    F = int(math.prod(x.shape[1:]))
    itemsize = jnp.dtype(x.dtype).itemsize

    # Per-sample Bernoulli(keep_prob) keep/drop decision + 1/keep_prob scaling.
    # Kept in f32; only the product is cast back to x.dtype (closer parity for
    # bf16/fp16 inputs than pre-casting the scale).
    u = jax.random.uniform(key, (B, 1), dtype=jnp.float32)
    scale = jnp.floor(keep_prob + u) / jnp.float32(keep_prob)        # (B,1) f32

    # Small / fusable inputs: pure-JAX fused multiply (no extra HBM round trip).
    if x.size * itemsize < min_pallas_bytes:
        return (x.reshape(B, F) * scale).astype(x.dtype).reshape(x.shape)

    xf = x.reshape(B, F)
    B_eff, F_eff = B, F

    # Small-batch repack: with B < 8 only B of 8 sublanes per vreg would be
    # used; reshape row-major to (B * F//L, L) with L a multiple of 128
    # dividing F, repeating the per-sample scale per row.
    if B < 8 and F % 128 == 0:
        L = None
        for cand in (16384, 8192, 4096, 2048, 1024, 512, 256, 128):
            if F % cand == 0 and B * (F // cand) >= 8:
                L = cand
                break
        if L is not None:
            rows_per_sample = F // L
            xf = xf.reshape(B * rows_per_sample, L)
            scale = jnp.repeat(scale, rows_per_sample, axis=0)
            B_eff, F_eff = B * rows_per_sample, L

    # Tile selection: full batch dim if small (always legal), else 256 rows.
    # Grow TN (lanes) toward the per-buffer byte target; 128-aligned unless it
    # covers the full feature dim (full-dim blocks are always legal).
    TB = B_eff if B_eff <= 256 else 256
    target = _per_buffer_target_bytes()
    TN = max(128, (target // (TB * itemsize)) // 128 * 128)
    if TN >= F_eff:
        TN = F_eff

    tile_bytes = TB * TN * itemsize
    # Double-buffered in + out (+ scale + headroom); capped well under the
    # smallest physical VMEM (v7x: 64 MiB).
    vmem_limit = int(min(max(4 * tile_bytes + (6 << 20), 16 << 20), 48 << 20))

    # Feature axis first so v7x's two TensorCores both get grid work even when
    # the batch axis collapses to a single block.
    grid = (pl.cdiv(F_eff, TN), pl.cdiv(B_eff, TB))

    out_flat = pl.pallas_call(
        _drop_path_kernel,
        out_shape=jax.ShapeDtypeStruct((B_eff, F_eff), x.dtype),
        grid=grid,
        in_specs=[
            pl.BlockSpec((TB, 1), lambda jf, ib: (ib, 0)),     # per-sample scale
            pl.BlockSpec((TB, TN), lambda jf, ib: (ib, jf)),   # x tile
        ],
        out_specs=pl.BlockSpec((TB, TN), lambda jf, ib: (ib, jf)),
        compiler_params=pltpu.CompilerParams(
            dimension_semantics=("parallel", "parallel"),
            vmem_limit_bytes=vmem_limit),
        cost_estimate=pl.CostEstimate(
            flops=B_eff * F_eff,
            transcendentals=0,
            bytes_accessed=2 * B_eff * F_eff * itemsize + 4 * B_eff),
    )(scale, xf)

    return out_flat.reshape(x.shape)


def _ref_drop_path(x, drop_prob, key):
    """Pure-JAX reference reproducing the torch formula with the same randoms."""
    keep_prob = 1.0 - drop_prob
    u = jax.random.uniform(key, (x.shape[0], 1), dtype=jnp.float32)
    mask = jnp.floor(keep_prob + u).reshape((x.shape[0],) + (1,) * (x.ndim - 1))
    return x / keep_prob * mask


if __name__ == "__main__":
    root = jax.random.PRNGKey(0)
    kx, kd = jax.random.split(root)

    drop_prob = 0.5

    # Small NCHW input consistent with how DropPath is used in DIMT blocks.
    x = jax.random.normal(kx, (2, 4, 16, 16), dtype=jnp.float32)

    # Training path through the Pallas kernel (force it past the JAX fast path).
    y_train = drop_path_pallas(x, drop_prob=drop_prob, training=True, key=kd,
                               min_pallas_bytes=0)
    y_train = jax.block_until_ready(y_train)
    assert jnp.allclose(y_train, _ref_drop_path(x, drop_prob, kd),
                        atol=1e-6), "training-path mismatch"

    # Default routing for tiny inputs (pure-JAX fused path) must agree too.
    y_fast = drop_path_pallas(x, drop_prob=drop_prob, training=True, key=kd)
    y_fast = jax.block_until_ready(y_fast)
    assert jnp.allclose(y_fast, _ref_drop_path(x, drop_prob, kd),
                        atol=1e-6), "fast-path mismatch"

    # Eval path (and drop_prob == 0): identity.
    y_eval = drop_path_pallas(x, drop_prob=drop_prob, training=False)
    y_eval = jax.block_until_ready(y_eval)
    assert jnp.array_equal(y_eval, x), "eval-path mismatch"

    # Non-aligned shape (F = 4500, not a multiple of 128; B = 3) exercises the
    # un-repacked full-dim tile path with partial-block handling.
    x2 = jax.random.normal(kx, (3, 5, 30, 30), dtype=jnp.float32)
    y2 = drop_path_pallas(x2, drop_prob=drop_prob, training=True, key=kd,
                          min_pallas_bytes=0)
    y2 = jax.block_until_ready(y2)
    assert jnp.allclose(y2, _ref_drop_path(x2, drop_prob, kd),
                        atol=1e-6), "non-aligned-shape mismatch"

    print("KERNEL_OK")
</pallas_src>

<mosaic_0001>
module attributes {stable_mosaic.version = 11 : i64} {
  func.func @_drop_path_kernel(%arg0: i32, %arg1: i32, %arg2: memref<8x1xf32, #tpu.memory_space<vmem>>, %arg3: memref<8x256xf32, #tpu.memory_space<vmem>>, %arg4: memref<8x256xf32, #tpu.memory_space<vmem>>) attributes {dimension_semantics = [#tpu.dimension_semantics<parallel>, #tpu.dimension_semantics<parallel>], iteration_bounds = array<i64: 1, 1>, scalar_prefetch = 0 : i64, scratch_operands = 0 : i64, tpu.core_type = #tpu.core_type<tc>, window_params = [{transform_indices = @transform_0, window_bounds = array<i64: 8, 1>}, {transform_indices = @transform_1, window_bounds = array<i64: 8, 256>}, {transform_indices = @transform_2, window_bounds = array<i64: 8, 256>}]} {
    %c0 = arith.constant 0 : index
    %c0_0 = arith.constant 0 : index
    %0 = vector.load %arg3[%c0, %c0_0] : memref<8x256xf32, #tpu.memory_space<vmem>>, vector<8x256xf32>
    %c0_1 = arith.constant 0 : index
    %c0_2 = arith.constant 0 : index
    %1 = vector.load %arg2[%c0_1, %c0_2] : memref<8x1xf32, #tpu.memory_space<vmem>>, vector<8x1xf32>
    %2 = vector.broadcast %1 : vector<8x1xf32> to vector<8x256xf32>
    %3 = arith.mulf %0, %2 : vector<8x256xf32>
    %c0_3 = arith.constant 0 : index
    %c0_4 = arith.constant 0 : index
    %4 = vector.load %arg4[%c0_3, %c0_4] : memref<8x256xf32, #tpu.memory_space<vmem>>, vector<8x256xf32>
    tpu.vector_store %arg4[%c0_3, %c0_4], %3 {strides = array<i32>} : memref<8x256xf32, #tpu.memory_space<vmem>>, vector<8x256xf32>,
    return
  }
  func.func @transform_0(%arg0: i32, %arg1: i32) -> (i32, i32) {
    %c0_i32 = arith.constant 0 : i32
    %c0_i32_0 = arith.constant 0 : i32
    return %arg1, %c0_i32 : i32, i32
  }
  func.func @transform_1(%arg0: i32, %arg1: i32) -> (i32, i32) {
    %c0_i32 = arith.constant 0 : i32
    return %arg1, %arg0 : i32, i32
  }
  func.func @transform_2(%arg0: i32, %arg1: i32) -> (i32, i32) {
    %c0_i32 = arith.constant 0 : i32
    return %arg1, %arg0 : i32, i32
  }
}

</mosaic_0001>

<bundles_post_ra>
// kernel: tpu_custom_call.1
= control target key start
LH: loop header
LB: loop body
LE: loop exit
PB: predicated region body
PF: predicated region fallthrough
CT: control target
= control target key end

     0   :  { %7 = vsyncpa [#allocation3], 0  ;;  %s148_s0 = inlined_call_operand.vmem [shape: f32[8,1], index: 0, kind: input, shape index: {}]   ;;  %s149_s1 = inlined_call_operand.hbm [shape: f32[8,256], index: 1, kind: input, shape index: {}]   ;;  %s150_s2 = inlined_call_operand.hbm [shape: f32[8,256], index: 2, kind: output, shape index: {}]  }
   0x1   :  { %8 = vsyncpa [#allocation4], 0  ;;  %s103_s9 = smov [#allocation2]   ;;  %s55_s13 = scalar_lea.hbm %s149_s1, 256 }
   0x2   :  { %s17_s10 = sshll.u32 %s103_s9, 4  ;;  %p56_p0 = scmp.ne.s32.totalorder %s149_s1, %s55_s13  ;;  %s18_s10 = int_to_ptr.vmem [resolvable:$true] %s17_s10 }
   0x3   :  { %p59_p1 = scmp.lt.u32.totalorder %s55_s13, %s149_s1 }
   0x5   :  { %p61_p2 = pnand %p59_p1, %p56_p0 }
   0x7   :  { %64 = shalt.err (!%p61_p2)
}
   0x8   :  { %s65_s18 = scalar_lea.vmem %s18_s10, 256  ;;  %p70_p4 = scmp.lt.s32.totalorder %s18_s10, %s18_s10 }
   0x9   :  { %p66_p3 = scmp.ne.s32.totalorder %s18_s10, %s65_s18  ;;  %p71_p5 = scmp.lt.s32.totalorder %s65_s18, %s65_s18 }
   0xb   :  { %p72_p6 = por %p71_p5, %p70_p4 }
   0xd   :  { %p73_p7 = pnand %p72_p6, %p66_p3 }
   0xf   :  { %76 = shalt.err (!%p73_p7)
}
  0x10   :  { %20 = dma.hbm_to_vmem [thread:$0]  %s149_s1, 256, %s18_s10, [#allocation3]  }
  0x11   :  { %99 = dma.done.wait [#allocation3], 256  }
  0x12   :  { %100 = vsyncadd [#allocation3], 4294967040  ;;  %v104_v0 = vmov 0   ;;  %v26_v1 = vld [vmem:[%s148_s0] sm:$0xff]  ;;  %v25_v3 = vld [vmem:[#allocation2 + $0x8] sm:$0xff]  ;;  %s105_s23 = smov [#allocation5]  }
  0x13   :  { %54 = vset.pattern.permute.xlu0 %v104_v0  ;;  %v24_v2 = vld [vmem:[#allocation2] sm:$0xff]  ;;  %s42_s24 = sshll.u32 %s105_s23, 4  ;;  %s43_s24 = int_to_ptr.vmem [resolvable:$true] %s42_s24 }
  0x14   :  { %29 = vperm.xlu0 %54, %v26_v1   ;;  %s77_s1 = scalar_lea.vmem %s43_s24, 256  ;;  %p82_p9 = scmp.lt.s32.totalorder %s43_s24, %s43_s24 }
  0x15   :  { %p78_p8 = scmp.ne.s32.totalorder %s43_s24, %s77_s1  ;;  %p83_p10 = scmp.lt.s32.totalorder %s77_s1, %s77_s1 }
  0x17   :  { %p84_p11 = por %p83_p10, %p82_p9 }
  0x19   :  { %p85_p12 = pnand %p84_p11, %p78_p8 }
  0x93   :  { %v30_v4 = vpop.permute.xlu0 %29 }
  0x94   :  { %v32_v5 = vmul.f32 %v30_v4, %v24_v2  ;;  %v33_v6 = vmul.f32 %v30_v4, %v25_v3 }
  0x96   :  { %34 = vst [vmem:[#allocation5] sm:$0xff] %v32_v5  ;;  %35 = vst [vmem:[#allocation5 + $0x8] sm:$0xff] %v33_v6 }
  0x97   :  { %88 = shalt.err (!%p85_p12)
}
  0x98   :  { %s89_s26 = scalar_lea.hbm %s150_s2, 256 }
  0x99   :  { %p90_p13 = scmp.ne.s32.totalorder %s150_s2, %s89_s26  ;;  %p93_p0 = scmp.lt.u32.totalorder %s89_s26, %s150_s2 }
  0x9b   :  { %p95_p1 = pnand %p93_p0, %p90_p13 }
  0x9d   :  { %98 = shalt.err (!%p95_p1)
}
  0x9e   :  { %45 = dma.vmem_to_hbm [thread:$0]  %s43_s24, 256, %s150_s2, [#allocation4]  }
  0x9f   :  { %101 = dma.done.wait [#allocation4], 256  }
  0xa0   :  { %102 = vsyncadd [#allocation4], 4294967040 }
  0xa1   :  { %49 = vsyncpa [#allocation3], 1 }
  0xa2   :  { %50 = vsyncpa [#allocation4], 1 }

</bundles_post_ra>
